<compile_context>
chip_gen: v6e
topology: v6e:2x2x1
jax: 0.10.0
libtpu: 0.0.40
codegen_flags: <defaults>
</compile_context>

<pallas_src>
import functools

import jax
import jax.numpy as jnp
from jax.experimental import pallas as pl
from jax.experimental.pallas import tpu as pltpu

_LANE = 128
_ACC_ROWS = 32                       # accumulator sublanes: 4 f32 vregs -> ILP
_MIN_PALLAS_ELEMS = 1 << 20          # below this, plain jnp beats a launch
_MiB = 1 << 20


@functools.lru_cache(maxsize=1)
def _tpu_config():
    """Returns (num_tensorcores, tile_bytes_per_input, vmem_limit_bytes)."""
    kind = ""
    try:
        kind = jax.devices()[0].device_kind.lower()
    except Exception:  # pragma: no cover - defensive; fall through to default
        pass
    if "v7" in kind:
        # 2 TCs/chip, only 64 MiB physical VMEM per TC -> explicit tight limit.
        return 2, 4 * _MiB, 48 * _MiB
    if "v6" in kind:
        # 1 TC/chip, 128 MiB physical VMEM -> 4 MiB tiles, generous limit.
        return 1, 4 * _MiB, 96 * _MiB
    if "v5e" in kind or "v5 lite" in kind or "v5lite" in kind:
        # 1 TC/chip; 2 MiB tiles already sit near the ~0.82 TB/s roofline.
        return 1, 2 * _MiB, 64 * _MiB
    if "v5" in kind or "v4" in kind:
        # v5p / v4 megacore: 2 TCs per device, plenty of VMEM.
        return 2, 4 * _MiB, 96 * _MiB
    # Unknown / older generation: conservative tile, default scoped VMEM.
    return 1, 1 * _MiB, None


def _elem(diff, op):
    return diff * diff if op == "sq" else jnp.abs(diff)


def _plain_sum(preds, targets, op):
    """Plain-JAX sum of (p-t)^2 or |p-t| in f32 (fallback / tail path)."""
    d = preds.astype(jnp.float32) - targets.astype(jnp.float32)
    return jnp.sum(_elem(d, op))


def _reduce_kernel(p_ref, t_ref, acc_ref, *, op, rows, block_rows, inner,
                   acc_rows, needs_mask):
    p_idx = pl.program_id(0)   # parallel axis (TensorCore split on 2-TC chips)
    i_idx = pl.program_id(1)   # reduction axis

    @pl.when(i_idx == 0)
    def _():
        acc_ref[...] = jnp.zeros_like(acc_ref)

    # Cast to f32 in-kernel (free relative to the DMA); inputs stream at their
    # native width.
    d = p_ref[...].astype(jnp.float32) - t_ref[...].astype(jnp.float32)
    v = _elem(d, op)

    def _accumulate(val):
        # Fold the block to (acc_rows, 128): acc_rows/8 independent vreg add
        # chains (ILP across VALU slots); the single cross-lane reduce happens
        # once in the wrapper.
        acc_ref[...] += val.reshape(-1, acc_rows, _LANE).sum(axis=0)

    if not needs_mask:
        _accumulate(v)
    else:
        start = (p_idx * inner + i_idx) * block_rows
        is_full = start + block_rows <= rows

        @pl.when(is_full)
        def _():
            # Hot path: full blocks never pay for the mask.
            _accumulate(v)

        @pl.when(jnp.logical_not(is_full))
        def _():
            # Partial last block / clamped over-cover blocks only.  Keep the
            # select (NOT a 0/1-mask multiply): the over-read region may hold
            # NaN/Inf and NaN * 0 == NaN.
            row_ids = start + jax.lax.broadcasted_iota(
                jnp.int32, (block_rows, _LANE), 0)
            _accumulate(jnp.where(row_ids < rows, v, 0.0))


def _reduce_sum(preds, targets, op, min_pallas_elems=_MIN_PALLAS_ELEMS,
                tile_bytes=None):
    """Sum-reduce (preds - targets)^2 or |preds - targets|; returns (sum, n)."""
    assert preds.shape == targets.shape, "preds/targets shape mismatch"
    total = preds.size

    item_p = jnp.dtype(preds.dtype).itemsize
    item_t = jnp.dtype(targets.dtype).itemsize
    # The narrower dtype packs more sublanes per (32-bit x 8 x 128) tile:
    # f32 -> 8 rows, bf16 -> 16, int8/fp8 -> 32.  Keep the kernel slab a
    # multiple of that so narrow-dtype arrays never end mid-packed-tile.
    packing = max(32 // min(item_p, item_t), 8)
    align = packing * _LANE

    # Small-input fallback: a pallas_call can't win here.
    if total < max(min_pallas_elems, 1) or total < align:
        return _plain_sum(preds, targets, op), total

    num_cores, auto_tile_bytes, vmem_limit = _tpu_config()
    if tile_bytes is None:
        tile_bytes = auto_tile_bytes

    p_flat = preds.reshape(-1)
    t_flat = targets.reshape(-1)

    main = (total // align) * align
    tail_sum = jnp.float32(0.0)
    if main != total:
        # Small remainder handled in plain JAX -- no full-array concatenate /
        # zero-padding copy of both inputs.
        tail_sum = _plain_sum(p_flat[main:], t_flat[main:], op)
        p_flat = p_flat[:main]
        t_flat = t_flat[:main]

    rows = main // _LANE               # multiple of `packing` by construction
    p2 = p_flat.reshape(rows, _LANE)
    t2 = t_flat.reshape(rows, _LANE)

    # Dtype-scaled tile: a grid step always carries ~tile_bytes of HBM traffic
    # from the wider input, regardless of element width.
    max_item = max(item_p, item_t)
    block_rows = max(tile_bytes // (_LANE * max_item), packing)
    block_rows -= block_rows % packing
    block_rows = min(block_rows, rows)

    acc_rows = _ACC_ROWS
    while block_rows % acc_rows:
        acc_rows //= 2

    n_blocks = pl.cdiv(rows, block_rows)
    par = num_cores if n_blocks >= num_cores else 1
    inner = pl.cdiv(n_blocks, par)
    # Mask only needed if the grid over-covers the array (partial last block
    # or uneven split across the parallel axis); even then only the partial /
    # over-cover steps execute the masked branch.
    needs_mask = (rows % block_rows != 0) or (par * inner != n_blocks)

    def in_map(p, i):
        # Clamp so over-covering (p, i) pairs never index past the array; the
        # in-kernel masked branch zeroes their contribution.
        return (jnp.minimum(p * inner + i, n_blocks - 1), 0)

    kernel = functools.partial(
        _reduce_kernel, op=op, rows=rows, block_rows=block_rows, inner=inner,
        acc_rows=acc_rows, needs_mask=needs_mask)

    partials = pl.pallas_call(
        kernel,
        out_shape=jax.ShapeDtypeStruct((par * acc_rows, _LANE), jnp.float32),
        grid_spec=pltpu.PrefetchScalarGridSpec(
            num_scalar_prefetch=0,
            grid=(par, inner),
            in_specs=[
                pl.BlockSpec((block_rows, _LANE), in_map),
                pl.BlockSpec((block_rows, _LANE), in_map),
            ],
            # Same block across the reduction axis -> resident accumulator.
            out_specs=pl.BlockSpec((acc_rows, _LANE), lambda p, i: (p, 0)),
        ),
        compiler_params=pltpu.CompilerParams(
            dimension_semantics=("parallel", "arbitrary"),
            vmem_limit_bytes=vmem_limit),
    )(p2, t2)

    return jnp.sum(partials) + tail_sum, total


class ImageLoss:
    """JAX/Pallas port of the PyTorch ImageLoss module."""

    def __init__(self, loss_type="mse", min_pallas_elems=_MIN_PALLAS_ELEMS,
                 tile_bytes=None):
        self.loss_type = loss_type.lower()
        self.min_pallas_elems = min_pallas_elems
        self.tile_bytes = tile_bytes          # None -> generation-detected
        if self.loss_type not in ("mse", "mae", "psnr", "ssim"):
            raise ValueError(f"Unsupported loss type: {self.loss_type}")

    def _sum(self, preds, targets, op):
        return _reduce_sum(preds, targets, op, self.min_pallas_elems,
                           self.tile_bytes)

    def __call__(self, preds, targets):
        if self.loss_type == "mse":
            s, n = self._sum(preds, targets, "sq")
            return s / n
        if self.loss_type == "mae":
            s, n = self._sum(preds, targets, "abs")
            return s / n
        if self.loss_type == "psnr":
            # PSNR = 10 * log10(MAX^2 / MSE); module returns -psnr.
            # TODO(synk): PSNR criterion class not provided in the source;
            # assume data_range = 1.0 and clamp MSE at 1e-12.
            s, n = self._sum(preds, targets, "sq")
            mse = s / n
            psnr = 10.0 * jnp.log10(1.0 / jnp.maximum(mse, 1e-12))
            return -psnr
        # TODO(synk): SSIM criterion class not defined in the provided module;
        # no reference semantics to reproduce.
        raise NotImplementedError(
            "ssim loss not available (SSIM class not provided)")


if __name__ == "__main__":
    key = jax.random.PRNGKey(0)
    k1, k2, k3, k4 = jax.random.split(key, 4)

    # Small NCHW demo shapes.  min_pallas_elems=0 forces the Pallas path and
    # tile_bytes=8 KiB forces multi-block grids / the masked last block even
    # at these sizes; production defaults use generation-sized multi-MiB tiles
    # and fall back to plain jnp below 1M elements.
    preds = jax.random.normal(k1, (2, 4, 16, 16), dtype=jnp.float32)
    targets = jax.random.normal(k2, (2, 4, 16, 16), dtype=jnp.float32)

    loss_mse = ImageLoss("mse", min_pallas_elems=0, tile_bytes=8192)
    loss_mae = ImageLoss("mae", min_pallas_elems=0, tile_bytes=8192)
    loss_psnr = ImageLoss("psnr", min_pallas_elems=0, tile_bytes=8192)

    mse = loss_mse(preds, targets)
    mae = loss_mae(preds, targets)
    psnr = loss_psnr(preds, targets)
    jax.block_until_ready((mse, mae, psnr))

    ref_mse = jnp.mean((preds - targets) ** 2)
    ref_mae = jnp.mean(jnp.abs(preds - targets))
    ref_psnr = -10.0 * jnp.log10(1.0 / jnp.maximum(ref_mse, 1e-12))
    assert jnp.allclose(mse, ref_mse, rtol=1e-5, atol=1e-6)
    assert jnp.allclose(mae, ref_mae, rtol=1e-5, atol=1e-6)
    assert jnp.allclose(psnr, ref_psnr, rtol=1e-5, atol=1e-6)

    # Multi-block grid with a partial (masked) last block: rows=24, block=16.
    p_m = jax.random.normal(k3, (2, 4, 24, 16), dtype=jnp.float32)
    t_m = jax.random.normal(k4, (2, 4, 24, 16), dtype=jnp.float32)
    mse_m = loss_mse(p_m, t_m)
    ref_m = jnp.mean((p_m - t_m) ** 2)
    assert jnp.allclose(mse_m, ref_m, rtol=1e-5, atol=1e-6)

    # bf16 inputs stream at native (half) width; the kernel casts to f32.
    # Also exercises the dtype-dependent alignment + plain-JAX tail path.
    p16 = jax.random.normal(k3, (2, 4, 24, 24), dtype=jnp.bfloat16)
    t16 = jax.random.normal(k4, (2, 4, 24, 24), dtype=jnp.bfloat16)
    mse16 = loss_mse(p16, t16)
    ref16 = jnp.mean((p16.astype(jnp.float32) - t16.astype(jnp.float32)) ** 2)
    assert jnp.allclose(mse16, ref16, rtol=1e-5, atol=1e-6)

    # Non-128-aligned element count -> kernel main path + plain-JAX tail.
    p_odd = jax.random.normal(k3, (2, 3, 17, 19), dtype=jnp.float32)
    t_odd = jax.random.normal(k4, (2, 3, 17, 19), dtype=jnp.float32)
    mae_odd = loss_mae(p_odd, t_odd)
    ref_odd = jnp.mean(jnp.abs(p_odd - t_odd))
    assert jnp.allclose(mae_odd, ref_odd, rtol=1e-5, atol=1e-6)

    # Auto (generation-detected) tile size + vmem limit path.
    p_big = jax.random.normal(k1, (4, 3, 128, 128), dtype=jnp.float32)
    t_big = jax.random.normal(k2, (4, 3, 128, 128), dtype=jnp.float32)
    mse_big = ImageLoss("mse", min_pallas_elems=0)(p_big, t_big)
    ref_big = jnp.mean((p_big - t_big) ** 2)
    assert jnp.allclose(mse_big, ref_big, rtol=1e-5, atol=1e-6)

    # Default (production) threshold: small inputs use the plain-jnp fallback.
    mse_fallback = ImageLoss("mse")(preds, targets)
    assert jnp.allclose(mse_fallback, ref_mse, rtol=1e-5, atol=1e-6)

    jax.block_until_ready((mse_m, mse16, mae_odd, mse_big, mse_fallback))
    print("KERNEL_OK")
</pallas_src>

<mosaic_0001>
module attributes {stable_mosaic.version = 11 : i64} {
  func.func @_reduce_kernel(%arg0: i32, %arg1: i32, %arg2: memref<16x128xf32, #tpu.memory_space<vmem>>, %arg3: memref<16x128xf32, #tpu.memory_space<vmem>>, %arg4: memref<16x128xf32, #tpu.memory_space<vmem>>) attributes {dimension_semantics = [#tpu.dimension_semantics<parallel>, #tpu.dimension_semantics<arbitrary>], iteration_bounds = array<i64: 1, 1>, scalar_prefetch = 0 : i64, scratch_operands = 0 : i64, tpu.core_type = #tpu.core_type<tc>, window_params = [{transform_indices = @transform_0, window_bounds = array<i64: 16, 128>}, {transform_indices = @transform_1, window_bounds = array<i64: 16, 128>}, {transform_indices = @transform_2, window_bounds = array<i64: 16, 128>}]} {
    %c0_i32 = arith.constant 0 : i32
    %0 = arith.cmpi eq, %arg1, %c0_i32 : i32
    %1 = arith.extui %0 : i1 to i32
    %c0_i32_0 = arith.constant 0 : i32
    %2 = arith.cmpi ne, %1, %c0_i32_0 : i32
    scf.if %2 {
      %cst_8 = arith.constant 0.000000e+00 : f32
      %12 = vector.broadcast %cst_8 : f32 to vector<16x128xf32>
      %c0_9 = arith.constant 0 : index
      %c0_10 = arith.constant 0 : index
      %13 = vector.load %arg4[%c0_9, %c0_10] : memref<16x128xf32, #tpu.memory_space<vmem>>, vector<16x128xf32>
      tpu.vector_store %arg4[%c0_9, %c0_10], %12 {strides = array<i32>} : memref<16x128xf32, #tpu.memory_space<vmem>>, vector<16x128xf32>,
    } else {
    }
    %c0 = arith.constant 0 : index
    %c0_1 = arith.constant 0 : index
    %3 = vector.load %arg2[%c0, %c0_1] : memref<16x128xf32, #tpu.memory_space<vmem>>, vector<16x128xf32>
    %c0_2 = arith.constant 0 : index
    %c0_3 = arith.constant 0 : index
    %4 = vector.load %arg3[%c0_2, %c0_3] : memref<16x128xf32, #tpu.memory_space<vmem>>, vector<16x128xf32>
    %5 = arith.subf %3, %4 : vector<16x128xf32>
    %6 = arith.mulf %5, %5 : vector<16x128xf32>
    %c0_4 = arith.constant 0 : index
    %c0_5 = arith.constant 0 : index
    %7 = vector.load %arg4[%c0_4, %c0_5] : memref<16x128xf32, #tpu.memory_space<vmem>>, vector<16x128xf32>
    %8 = vector.shape_cast %6 : vector<16x128xf32> to vector<1x16x128xf32>
    %cst = arith.constant dense<0.000000e+00> : vector<16x128xf32>
    %9 = vector.multi_reduction <add>, %8, %cst [0] : vector<1x16x128xf32> to vector<16x128xf32>
    %10 = arith.addf %7, %9 : vector<16x128xf32>
    %c0_6 = arith.constant 0 : index
    %c0_7 = arith.constant 0 : index
    %11 = vector.load %arg4[%c0_6, %c0_7] : memref<16x128xf32, #tpu.memory_space<vmem>>, vector<16x128xf32>
    tpu.vector_store %arg4[%c0_6, %c0_7], %10 {strides = array<i32>} : memref<16x128xf32, #tpu.memory_space<vmem>>, vector<16x128xf32>,
    return
  }
  func.func @transform_0(%arg0: i32, %arg1: i32) -> (i32, i32) {
    %c1_i32 = arith.constant 1 : i32
    %0 = arith.muli %arg0, %c1_i32 : i32
    %1 = arith.addi %0, %arg1 : i32
    %c0_i32 = arith.constant 0 : i32
    %2 = arith.minsi %1, %c0_i32 : i32
    %c0_i32_0 = arith.constant 0 : i32
    %c0_i32_1 = arith.constant 0 : i32
    return %2, %c0_i32_0 : i32, i32
  }
  func.func @transform_1(%arg0: i32, %arg1: i32) -> (i32, i32) {
    %c1_i32 = arith.constant 1 : i32
    %0 = arith.muli %arg0, %c1_i32 : i32
    %1 = arith.addi %0, %arg1 : i32
    %c0_i32 = arith.constant 0 : i32
    %2 = arith.minsi %1, %c0_i32 : i32
    %c0_i32_0 = arith.constant 0 : i32
    %c0_i32_1 = arith.constant 0 : i32
    return %2, %c0_i32_0 : i32, i32
  }
  func.func @transform_2(%arg0: i32, %arg1: i32) -> (i32, i32) {
    %c0_i32 = arith.constant 0 : i32
    %c0_i32_0 = arith.constant 0 : i32
    return %arg0, %c0_i32 : i32, i32
  }
}

</mosaic_0001>

<bundles_post_ra>
// kernel: tpu_custom_call.1
= control target key start
LH: loop header
LB: loop body
LE: loop exit
PB: predicated region body
PF: predicated region fallthrough
CT: control target
= control target key end

     0   :  { %7 = vsyncpa [#allocation3], 0  ;;  %s214_s0 = inlined_call_operand.hbm [shape: f32[16,128], index: 0, kind: input, shape index: {}]   ;;  %s215_s1 = inlined_call_operand.hbm [shape: f32[16,128], index: 1, kind: input, shape index: {}]   ;;  %s216_s2 = inlined_call_operand.hbm [shape: f32[16,128], index: 2, kind: output, shape index: {}]  }
   0x1   :  { %8 = vsyncpa [#allocation6], 0 }
   0x2   :  { %9 = vsyncpa [#allocation4], 0  ;;  %s176_s9 = smov [#allocation2]  }
   0x3   :  { %s21_s10 = sshll.u32 %s176_s9, 4  ;;  %s22_s10 = int_to_ptr.vmem [resolvable:$true] %s21_s10 }
   0x4   :  { %s118_s11 = scalar_lea.vmem %s22_s10, 256  ;;  %p123_p1 = scmp.lt.s32.totalorder %s22_s10, %s22_s10 }
   0x5   :  { %p119_p0 = scmp.ne.s32.totalorder %s22_s10, %s118_s11  ;;  %p124_p2 = scmp.lt.s32.totalorder %s118_s11, %s118_s11 }
   0x7   :  { %p125_p3 = por %p124_p2, %p123_p1 }
   0x9   :  { %p126_p4 = pnand %p125_p3, %p119_p0 }
   0xb   :  { %129 = shalt.err (!%p126_p4)
}
   0xc   :  { %s177_s12 = smov 128   ;;  %s178_s13 = smov 8  }
   0xd   :  { %27 = dma.hbm_to_vmem [thread:$0]  %s214_s0, 256, %s22_s10, [#allocation3], %s177_s12, %s177_s12, %s178_s13  }
   0xe   :  { %s179_s16 = smov [#allocation5]  }
   0xf   :  { %s39_s17 = sshll.u32 %s179_s16, 4  ;;  %s40_s17 = int_to_ptr.vmem [resolvable:$true] %s39_s17 }
  0x10   :  { %s138_s18 = scalar_lea.vmem %s40_s17, 256  ;;  %p143_p6 = scmp.lt.s32.totalorder %s40_s17, %s40_s17 }
  0x11   :  { %p139_p5 = scmp.ne.s32.totalorder %s40_s17, %s138_s18  ;;  %p144_p7 = scmp.lt.s32.totalorder %s138_s18, %s138_s18 }
  0x13   :  { %p145_p8 = por %p144_p7, %p143_p6 }
  0x15   :  { %p146_p9 = pnand %p145_p8, %p139_p5 }
  0x17   :  { %149 = shalt.err (!%p146_p9)
}
  0x18   :  { %45 = dma.hbm_to_vmem [thread:$0]  %s215_s1, 256, %s40_s17, [#allocation6], %s177_s12, %s177_s12, %s178_s13  }
  0x19   :  { %170 = dma.done.wait [#allocation3], 256  }
  0x1a   :  { %171 = vsyncadd [#allocation3], 4294967040 }
  0x1b   :  { %172 = dma.done.wait [#allocation6], 256  }
  0x1c   :  { %173 = vsyncadd [#allocation6], 4294967040  ;;  %v66_v0 = vld [vmem:[#allocation2] sm:$0xff]  ;;  %v68_v1 = vld [vmem:[#allocation5] sm:$0xff]  ;;  %s180_s0 = smov [#allocation7]  }
  0x1d   :  { %v67_v2 = vld [vmem:[#allocation2 + $0x8] sm:$0xff]  ;;  %v70_v3 = vsub.f32 %v66_v0, %v68_v1  ;;  %v69_v4 = vld [vmem:[#allocation5 + $0x8] sm:$0xff]  ;;  %s87_s21 = sshll.u32 %s180_s0, 4  ;;  %s88_s21 = int_to_ptr.vmem [resolvable:$true] %s87_s21 }
  0x1e   :  { %v71_v5 = vsub.f32 %v67_v2, %v69_v4  ;;  %s150_s22 = scalar_lea.vmem %s88_s21, 256  ;;  %p155_p11 = scmp.lt.s32.totalorder %s88_s21, %s88_s21 }
  0x1f   :  { %v72_v6 = vmul.f32 %v70_v3, %v70_v3  ;;  %p151_p10 = scmp.ne.s32.totalorder %s88_s21, %s150_s22  ;;  %p156_p12 = scmp.lt.s32.totalorder %s150_s22, %s150_s22 }
  0x20   :  { %v73_v7 = vmul.f32 %v71_v5, %v71_v5 }
  0x21   :  { %80 = vst [vmem:[#allocation7] sm:$0xff] %v72_v6  ;;  %p157_p13 = por %p156_p12, %p155_p11 }
  0x22   :  { %81 = vst [vmem:[#allocation7 + $0x8] sm:$0xff] %v73_v7 }
  0x23   :  { %p158_p0 = pnand %p157_p13, %p151_p10 }
  0x25   :  { %161 = shalt.err (!%p158_p0)
}
  0x26   :  { %93 = dma.vmem_to_hbm [thread:$0]  %s88_s21, 256, %s216_s2, [#allocation4], %s177_s12, %s177_s12, %s178_s13  }
  0x27   :  { %174 = dma.done.wait [#allocation4], 256  }
  0x28   :  { %175 = vsyncadd [#allocation4], 4294967040 }
  0x29   :  { %97 = vsyncpa [#allocation3], 1 }
  0x2a   :  { %98 = vsyncpa [#allocation6], 1 }
  0x2b   :  { %99 = vsyncpa [#allocation4], 1 }

</bundles_post_ra>
